<compile_context>
chip_gen: v6e
topology: v6e:2x2x1
jax: 0.10.0
libtpu: 0.0.40
codegen_flags: <defaults>
</compile_context>

<pallas_src>
import functools

import jax
import jax.numpy as jnp
from jax.experimental import pallas as pl
from jax.experimental.pallas import tpu as pltpu


def _round_up(n, m):
    return ((n + m - 1) // m) * m


def _cdiv(a, b):
    return (a + b - 1) // b


def encoder_kernel(x_ref, w1_ref, b1_ref, w2_ref, b2_ref, w3_ref, b3_ref, o_ref):
    # x arrives f32 (no wrapper-side bf16 copy); cast on the VPU, contract on the MXU.
    x = x_ref[...].astype(jnp.bfloat16)
    # fc1 + relu (bf16 operands, f32 accumulation, f32 bias)
    h = jnp.dot(x, w1_ref[...], preferred_element_type=jnp.float32)
    h = jnp.maximum(h + b1_ref[...], 0.0)
    # fc2 + relu
    h = jnp.dot(h.astype(jnp.bfloat16), w2_ref[...], preferred_element_type=jnp.float32)
    h = jnp.maximum(h + b2_ref[...], 0.0)
    # fc3 (no activation)
    h = jnp.dot(h.astype(jnp.bfloat16), w3_ref[...], preferred_element_type=jnp.float32)
    o_ref[...] = (h + b3_ref[...]).astype(o_ref.dtype)


def prepare_params(params):
    """One-time cast of PyTorch-layout params ([in,out] W, [1,out] b) for the kernel.

    Do this once and reuse; it keeps the per-call path free of cast/pad ops and lets
    the resident-weight DMAs read bf16 directly.
    """
    f32 = jnp.float32
    bt = jnp.bfloat16
    return {
        "w1": params["w1"].astype(bt),
        "b1": params["b1"].reshape(1, -1).astype(f32),
        "w2": params["w2"].astype(bt),
        "b2": params["b2"].reshape(1, -1).astype(f32),
        "w3": params["w3"].astype(bt),
        "b3": params["b3"].reshape(1, -1).astype(f32),
    }


@functools.partial(jax.jit, static_argnames=("tb", "out_dtype"))
def encoder_forward(x, prep, tb=2048, out_dtype=jnp.bfloat16):
    """x: [B, o_dim] float32. prep: output of prepare_params (bf16 W, f32 b)."""
    w1, b1, w2, b2, w3, b3 = (prep[k] for k in ("w1", "b1", "w2", "b2", "w3", "b3"))

    B, o_dim = x.shape
    DIM = w1.shape[1]
    h_dim = w3.shape[1]

    # Adaptive batch tile: amortize the ~0.35us/step overhead with a large TB, bound
    # padding waste, and keep >=2 grid steps (when B allows) so the "parallel" batch
    # axis can shard across both v7x TensorCores.
    nsteps = max(_cdiv(B, tb), min(2, _cdiv(B, 16)))
    TB = _round_up(_cdiv(B, nsteps), 16)      # multiple of 16 for bf16 sublane packing
    B_pad = TB * nsteps

    if B_pad != B:
        x_p = jnp.zeros((B_pad, o_dim), x.dtype).at[:B].set(x)
    else:
        x_p = x

    out = pl.pallas_call(
        encoder_kernel,
        out_shape=jax.ShapeDtypeStruct((B_pad, h_dim), out_dtype),
        grid=(nsteps,),
        in_specs=[
            pl.BlockSpec((TB, o_dim), lambda i: (i, 0)),   # x: batch-tiled, pipelined
            pl.BlockSpec((o_dim, DIM), lambda i: (0, 0)),  # w1: VMEM-resident
            pl.BlockSpec((1, DIM), lambda i: (0, 0)),      # b1
            pl.BlockSpec((DIM, DIM), lambda i: (0, 0)),    # w2
            pl.BlockSpec((1, DIM), lambda i: (0, 0)),      # b2
            pl.BlockSpec((DIM, h_dim), lambda i: (0, 0)),  # w3
            pl.BlockSpec((1, h_dim), lambda i: (0, 0)),    # b3
        ],
        out_specs=pl.BlockSpec((TB, h_dim), lambda i: (i, 0)),
        compiler_params=pltpu.CompilerParams(
            # NOTE: benchmark pltpu.CORE_PARALLEL on v7x if the 2-TC split matters.
            dimension_semantics=("parallel",),
            vmem_limit_bytes=32 * 1024 * 1024,
        ),
    )(x_p, w1, b1, w2, b2, w3, b3)

    return out[:B] if B_pad != B else out


def init_params(key, o_dim, h_dim, DIM=256):
    """Deterministic init matching nn.Linear shapes (stored transposed: [in, out])."""
    ks = jax.random.split(key, 6)

    def lin(kw, kb, fan_in, fan_out):
        bound = 1.0 / jnp.sqrt(fan_in)
        w = jax.random.uniform(kw, (fan_in, fan_out), jnp.float32, -bound, bound)
        b = jax.random.uniform(kb, (1, fan_out), jnp.float32, -bound, bound)
        return w, b

    w1, b1 = lin(ks[0], ks[1], o_dim, DIM)
    w2, b2 = lin(ks[2], ks[3], DIM, DIM)
    w3, b3 = lin(ks[4], ks[5], DIM, h_dim)
    return {"w1": w1, "b1": b1, "w2": w2, "b2": b2, "w3": w3, "b3": b3}


def encoder_ref_matched(x, p):
    """Reference with the same bf16-operand / f32-accumulate numerics as the kernel."""
    bt = jnp.bfloat16
    h = jnp.dot(x.astype(bt), p["w1"].astype(bt), preferred_element_type=jnp.float32)
    h = jnp.maximum(h + p["b1"], 0.0)
    h = jnp.dot(h.astype(bt), p["w2"].astype(bt), preferred_element_type=jnp.float32)
    h = jnp.maximum(h + p["b2"], 0.0)
    h = jnp.dot(h.astype(bt), p["w3"].astype(bt), preferred_element_type=jnp.float32)
    return h + p["b3"]


def encoder_ref_f32(x, p):
    h = jnp.maximum(x @ p["w1"] + p["b1"], 0.0)
    h = jnp.maximum(h @ p["w2"] + p["b2"], 0.0)
    return h @ p["w3"] + p["b3"]


if __name__ == "__main__":
    key = jax.random.PRNGKey(0)
    B, o_dim, h_dim, DIM = 8, 16, 32, 256

    kx, kp = jax.random.split(key)
    x = jax.random.normal(kx, (B, o_dim), jnp.float32)
    params = init_params(kp, o_dim, h_dim, DIM)
    prep = prepare_params(params)          # one-time cast, reused across calls

    out = jax.block_until_ready(encoder_forward(x, prep))
    assert out.shape == (B, h_dim), out.shape
    assert out.dtype == jnp.bfloat16, out.dtype

    out_f32 = out.astype(jnp.float32)
    ref = encoder_ref_matched(x, params)
    ref_f32 = encoder_ref_f32(x, params)

    # Check against the numerics-matched (bf16-operand / f32-accum) reference; the
    # only extra error in the kernel is the final bf16 output rounding.
    assert jnp.allclose(out_f32, ref, atol=2e-2, rtol=2e-2), float(
        jnp.max(jnp.abs(out_f32 - ref))
    )
    # Informational: deviation from pure-f32 comes from bf16 rounding of x/W/output.
    _ = float(jnp.max(jnp.abs(out_f32 - ref_f32)))
    print("KERNEL_OK")
</pallas_src>

<mosaic_0001>
module attributes {stable_mosaic.version = 11 : i64} {
  func.func @encoder_kernel(%arg0: i32, %arg1: memref<16x16xf32, #tpu.memory_space<vmem>>, %arg2: memref<16x256xbf16, #tpu.memory_space<vmem>>, %arg3: memref<1x256xf32, #tpu.memory_space<vmem>>, %arg4: memref<256x256xbf16, #tpu.memory_space<vmem>>, %arg5: memref<1x256xf32, #tpu.memory_space<vmem>>, %arg6: memref<256x32xbf16, #tpu.memory_space<vmem>>, %arg7: memref<1x32xf32, #tpu.memory_space<vmem>>, %arg8: memref<16x32xbf16, #tpu.memory_space<vmem>>) attributes {dimension_semantics = [#tpu.dimension_semantics<parallel>], iteration_bounds = array<i64: 1>, scalar_prefetch = 0 : i64, scratch_operands = 0 : i64, tpu.core_type = #tpu.core_type<tc>, window_params = [{transform_indices = @transform_0, window_bounds = array<i64: 16, 16>}, {pipeline_mode = #tpu.pipeline_mode<synchronous>, transform_indices = @transform_1, window_bounds = array<i64: 16, 256>}, {pipeline_mode = #tpu.pipeline_mode<synchronous>, transform_indices = @transform_2, window_bounds = array<i64: 1, 256>}, {pipeline_mode = #tpu.pipeline_mode<synchronous>, transform_indices = @transform_3, window_bounds = array<i64: 256, 256>}, {pipeline_mode = #tpu.pipeline_mode<synchronous>, transform_indices = @transform_4, window_bounds = array<i64: 1, 256>}, {pipeline_mode = #tpu.pipeline_mode<synchronous>, transform_indices = @transform_5, window_bounds = array<i64: 256, 32>}, {pipeline_mode = #tpu.pipeline_mode<synchronous>, transform_indices = @transform_6, window_bounds = array<i64: 1, 32>}, {transform_indices = @transform_7, window_bounds = array<i64: 16, 32>}]} {
    %c0 = arith.constant 0 : index
    %c0_0 = arith.constant 0 : index
    %0 = vector.load %arg1[%c0, %c0_0] : memref<16x16xf32, #tpu.memory_space<vmem>>, vector<16x16xf32>
    %1 = arith.truncf %0 : vector<16x16xf32> to vector<16x16xbf16>
    %c0_1 = arith.constant 0 : index
    %c0_2 = arith.constant 0 : index
    %2 = vector.load %arg2[%c0_1, %c0_2] : memref<16x256xbf16, #tpu.memory_space<vmem>>, vector<16x256xbf16>
    %cst = arith.constant dense<0.000000e+00> : vector<16x256xf32>
    %3 = tpu.matmul %1, %2, %cst {dimension_numbers = #tpu.dot_dimension_numbers<[1], [0], [0], [1], [0, 0, 1, 1], [], []>} : vector<16x16xbf16>, vector<16x256xbf16>, vector<16x256xf32> -> vector<16x256xf32>
    %c0_3 = arith.constant 0 : index
    %c0_4 = arith.constant 0 : index
    %4 = vector.load %arg3[%c0_3, %c0_4] : memref<1x256xf32, #tpu.memory_space<vmem>>, vector<1x256xf32>
    %5 = vector.broadcast %4 : vector<1x256xf32> to vector<16x256xf32>
    %6 = arith.addf %3, %5 : vector<16x256xf32>
    %cst_5 = arith.constant 0.000000e+00 : f32
    %7 = vector.broadcast %cst_5 : f32 to vector<16x256xf32>
    %8 = arith.maximumf %6, %7 : vector<16x256xf32>
    %9 = arith.truncf %8 : vector<16x256xf32> to vector<16x256xbf16>
    %c0_6 = arith.constant 0 : index
    %c0_7 = arith.constant 0 : index
    %10 = vector.load %arg4[%c0_6, %c0_7] : memref<256x256xbf16, #tpu.memory_space<vmem>>, vector<256x256xbf16>
    %cst_8 = arith.constant dense<0.000000e+00> : vector<16x256xf32>
    %11 = tpu.matmul %9, %10, %cst_8 {dimension_numbers = #tpu.dot_dimension_numbers<[1], [0], [0], [1], [0, 0, 1, 1], [], []>} : vector<16x256xbf16>, vector<256x256xbf16>, vector<16x256xf32> -> vector<16x256xf32>
    %c0_9 = arith.constant 0 : index
    %c0_10 = arith.constant 0 : index
    %12 = vector.load %arg5[%c0_9, %c0_10] : memref<1x256xf32, #tpu.memory_space<vmem>>, vector<1x256xf32>
    %13 = vector.broadcast %12 : vector<1x256xf32> to vector<16x256xf32>
    %14 = arith.addf %11, %13 : vector<16x256xf32>
    %cst_11 = arith.constant 0.000000e+00 : f32
    %15 = vector.broadcast %cst_11 : f32 to vector<16x256xf32>
    %16 = arith.maximumf %14, %15 : vector<16x256xf32>
    %17 = arith.truncf %16 : vector<16x256xf32> to vector<16x256xbf16>
    %c0_12 = arith.constant 0 : index
    %c0_13 = arith.constant 0 : index
    %18 = vector.load %arg6[%c0_12, %c0_13] : memref<256x32xbf16, #tpu.memory_space<vmem>>, vector<256x32xbf16>
    %cst_14 = arith.constant dense<0.000000e+00> : vector<16x32xf32>
    %19 = tpu.matmul %17, %18, %cst_14 {dimension_numbers = #tpu.dot_dimension_numbers<[1], [0], [0], [1], [0, 0, 1, 1], [], []>} : vector<16x256xbf16>, vector<256x32xbf16>, vector<16x32xf32> -> vector<16x32xf32>
    %c0_15 = arith.constant 0 : index
    %c0_16 = arith.constant 0 : index
    %20 = vector.load %arg7[%c0_15, %c0_16] : memref<1x32xf32, #tpu.memory_space<vmem>>, vector<1x32xf32>
    %21 = vector.broadcast %20 : vector<1x32xf32> to vector<16x32xf32>
    %22 = arith.addf %19, %21 : vector<16x32xf32>
    %23 = arith.truncf %22 : vector<16x32xf32> to vector<16x32xbf16>
    %c0_17 = arith.constant 0 : index
    %c0_18 = arith.constant 0 : index
    %24 = vector.load %arg8[%c0_17, %c0_18] : memref<16x32xbf16, #tpu.memory_space<vmem>>, vector<16x32xbf16>
    tpu.vector_store %arg8[%c0_17, %c0_18], %23 {strides = array<i32>} : memref<16x32xbf16, #tpu.memory_space<vmem>>, vector<16x32xbf16>,
    return
  }
  func.func @transform_0(%arg0: i32) -> (i32, i32) {
    %c0_i32 = arith.constant 0 : i32
    %c0_i32_0 = arith.constant 0 : i32
    return %arg0, %c0_i32 : i32, i32
  }
  func.func @transform_1(%arg0: i32) -> (i32, i32) {
    %c0_i32 = arith.constant 0 : i32
    %c0_i32_0 = arith.constant 0 : i32
    %c0_i32_1 = arith.constant 0 : i32
    return %c0_i32, %c0_i32_0 : i32, i32
  }
  func.func @transform_2(%arg0: i32) -> (i32, i32) {
    %c0_i32 = arith.constant 0 : i32
    %c0_i32_0 = arith.constant 0 : i32
    %c0_i32_1 = arith.constant 0 : i32
    return %c0_i32, %c0_i32_0 : i32, i32
  }
  func.func @transform_3(%arg0: i32) -> (i32, i32) {
    %c0_i32 = arith.constant 0 : i32
    %c0_i32_0 = arith.constant 0 : i32
    %c0_i32_1 = arith.constant 0 : i32
    return %c0_i32, %c0_i32_0 : i32, i32
  }
  func.func @transform_4(%arg0: i32) -> (i32, i32) {
    %c0_i32 = arith.constant 0 : i32
    %c0_i32_0 = arith.constant 0 : i32
    %c0_i32_1 = arith.constant 0 : i32
    return %c0_i32, %c0_i32_0 : i32, i32
  }
  func.func @transform_5(%arg0: i32) -> (i32, i32) {
    %c0_i32 = arith.constant 0 : i32
    %c0_i32_0 = arith.constant 0 : i32
    %c0_i32_1 = arith.constant 0 : i32
    return %c0_i32, %c0_i32_0 : i32, i32
  }
  func.func @transform_6(%arg0: i32) -> (i32, i32) {
    %c0_i32 = arith.constant 0 : i32
    %c0_i32_0 = arith.constant 0 : i32
    %c0_i32_1 = arith.constant 0 : i32
    return %c0_i32, %c0_i32_0 : i32, i32
  }
  func.func @transform_7(%arg0: i32) -> (i32, i32) {
    %c0_i32 = arith.constant 0 : i32
    %c0_i32_0 = arith.constant 0 : i32
    return %arg0, %c0_i32 : i32, i32
  }
}

</mosaic_0001>

<bundles_post_ra>
// kernel: encoder_forward.1
= control target key start
LH: loop header
LB: loop body
LE: loop exit
PB: predicated region body
PF: predicated region fallthrough
CT: control target
= control target key end

     0   :  { %12 = vsyncpa [#allocation3], 0  ;;  %s737_s24 = smov [#allocation2]   ;;  %s859_s0 = inlined_call_operand.vmem [shape: f32[16,16], index: 0, kind: input, shape index: {}]   ;;  %s860_s1 = inlined_call_operand.vmem [shape: bf16[16,256], index: 1, kind: input, shape index: {}]   ;;  %s861_s2 = inlined_call_operand.vmem [shape: f32[1,256], index: 2, kind: input, shape index: {}]   ;;  %s862_s3 = inlined_call_operand.hbm [shape: bf16[256,256], index: 3, kind: input, shape index: {}]   ;;  %s863_s4 = inlined_call_operand.vmem [shape: f32[1,256], index: 4, kind: input, shape index: {}]   ;;  %s864_s5 = inlined_call_operand.vmem [shape: bf16[256,32], index: 5, kind: input, shape index: {}]   ;;  %s865_s6 = inlined_call_operand.vmem [shape: f32[1,32], index: 6, kind: input, shape index: {}]   ;;  %s866_s7 = inlined_call_operand.vmem [shape: bf16[16,32], index: 7, kind: output, shape index: {}]  }
   0x1   :  { %s24_s25 = sshll.u32 %s737_s24, 4  ;;  %s25_s25 = int_to_ptr.vmem [resolvable:$true] %s24_s25 }
   0x2   :  { %s723_s26 = scalar_lea.vmem %s25_s25, 4096  ;;  %p728_p1 = scmp.lt.s32.totalorder %s25_s25, %s25_s25 }
   0x3   :  { %p724_p0 = scmp.ne.s32.totalorder %s25_s25, %s723_s26  ;;  %p729_p2 = scmp.lt.s32.totalorder %s723_s26, %s723_s26 }
   0x5   :  { %p730_p3 = por %p729_p2, %p728_p1 }
   0x7   :  { %p731_p4 = pnand %p730_p3, %p724_p0 }
   0x9   :  { %734 = shalt.err (!%p731_p4)
}
   0xa   :  { %s738_s27 = smov 128   ;;  %s739_s28 = smov 8  }
   0xb   :  { %30 = dma.hbm_to_vmem [thread:$0]  %s862_s3, 4096, %s25_s25, [#allocation3], %s738_s27, %s738_s27, %s739_s28  }
   0xc   :  { %735 = dma.done.wait [#allocation3], 4096  }
   0xd   :  { %736 = vsyncadd [#allocation3], 4294963200  ;;  %v740_v0 = vmov 0   ;;  %v648_v1 = vld [vmem:[%s860_s1 + $0x4] ss:$8 sps:$4 sm:$0xff]   ;;  %vm68_vm0 = vcmask 130048   ;;  %v48_v48 = vlaneseq }
   0xe   :  { %104 = vmatprep.mubr.bf16.mxu0 %v740_v0  ;;  %v650_v2 = vld [vmem:[%s860_s1] ss:$8 sps:$4 sm:$0xff]   ;;  %86 = vmatprep.subr.bf16.mxu0 %v648_v1  ;;  %v651_v6 = vld [vmem:[#allocation2 + $0x74] ss:$8 sps:$4 sm:$0xff]   ;;  %v653_v7 = vld [vmem:[#allocation2 + $0x70] ss:$8 sps:$4 sm:$0xff]  }
   0xf   :  { %v41_v3 = vld [vmem:[%s859_s0] sm:$0xff]  ;;  %v42_v4 = vld [vmem:[%s859_s0 + $0x8] sm:$0xff]  ;;  %87 = vmatpush1.bf16.msra.mxu0 %v650_v2  ;;  %325 = vmatprep.subr.bf16.mxu1 %v651_v6  ;;  %v657_v10 = vld [vmem:[#allocation2 + $0x54] ss:$8 sps:$4 sm:$0xff]   ;;  %v49_v49 = vshrl.u32 %v48_v48, 7  ;;  %vm558_vm1 = vcmask 257024  }
  0x10   :  { %v43_v5 = vpack.c.bf16 %v42_v4, %v41_v3  ;;  %v654_v8 = vld [vmem:[#allocation2 + $0x64] ss:$8 sps:$4 sm:$0xff]   ;;  %326 = vmatpush1.bf16.msra.mxu1 %v653_v7  ;;  %v656_v9 = vld [vmem:[#allocation2 + $0x60] ss:$8 sps:$4 sm:$0xff]   ;;  %v659_v11 = vld [vmem:[#allocation2 + $0x50] ss:$8 sps:$4 sm:$0xff]  }
  0x11   :  { %327 = vmatprep.subr.bf16.mxu1 %v654_v8  ;;  %v660_v12 = vld [vmem:[#allocation2 + $0x44] ss:$8 sps:$4 sm:$0xff]   ;;  %v662_v13 = vld [vmem:[#allocation2 + $0x40] ss:$8 sps:$4 sm:$0xff]   ;;  %v663_v14 = vld [vmem:[#allocation2 + $0x34] ss:$8 sps:$4 sm:$0xff]  }
  0x12   :  { %568 = vmatmul.mubr.msk.bf16.vlgmr.msra.gmra.mxu0 %vm68_vm0, %v43_v5  ;;  %v665_v15 = vld [vmem:[#allocation2 + $0x30] ss:$8 sps:$4 sm:$0xff]   ;;  %v666_v16 = vld [vmem:[#allocation2 + $0x24] ss:$8 sps:$4 sm:$0xff]   ;;  %v668_v17 = vld [vmem:[#allocation2 + $0x20] ss:$8 sps:$4 sm:$0xff]  }
  0x13   :  { %v669_v18 = vld [vmem:[#allocation2 + $0x14] ss:$8 sps:$4 sm:$0xff]   ;;  %v671_v19 = vld [vmem:[#allocation2 + $0x10] ss:$8 sps:$4 sm:$0xff]   ;;  %v672_v20 = vld [vmem:[#allocation2 + $0x4] ss:$8 sps:$4 sm:$0xff]  }
  0x14   :  { %328 = vmatpush1.bf16.msra.mxu1 %v656_v9  ;;  %v674_v21 = vld [vmem:[#allocation2] ss:$8 sps:$4 sm:$0xff]   ;;  %v675_v22 = vld [vmem:[#allocation2 + $0xf4] ss:$8 sps:$4 sm:$0xff]   ;;  %v677_v23 = vld [vmem:[#allocation2 + $0xf0] ss:$8 sps:$4 sm:$0xff]  }
  0x15   :  { %329 = vmatprep.subr.bf16.mxu1 %v657_v10  ;;  %v678_v24 = vld [vmem:[#allocation2 + $0xe4] ss:$8 sps:$4 sm:$0xff]   ;;  %v680_v25 = vld [vmem:[#allocation2 + $0xe0] ss:$8 sps:$4 sm:$0xff]   ;;  %v681_v26 = vld [vmem:[#allocation2 + $0xd4] ss:$8 sps:$4 sm:$0xff]  }
  0x16   :  { %v683_v27 = vld [vmem:[#allocation2 + $0xd0] ss:$8 sps:$4 sm:$0xff]   ;;  %v684_v28 = vld [vmem:[#allocation2 + $0xc4] ss:$8 sps:$4 sm:$0xff]   ;;  %v686_v29 = vld [vmem:[#allocation2 + $0xc0] ss:$8 sps:$4 sm:$0xff]  }
  0x17   :  { %v687_v30 = vld [vmem:[#allocation2 + $0xb4] ss:$8 sps:$4 sm:$0xff]   ;;  %v689_v31 = vld [vmem:[#allocation2 + $0xb0] ss:$8 sps:$4 sm:$0xff]   ;;  %v690_v32 = vld [vmem:[#allocation2 + $0xa4] ss:$8 sps:$4 sm:$0xff]  }
  0x18   :  { %330 = vmatpush1.bf16.msra.mxu1 %v659_v11  ;;  %v692_v33 = vld [vmem:[#allocation2 + $0xa0] ss:$8 sps:$4 sm:$0xff]   ;;  %v693_v34 = vld [vmem:[#allocation2 + $0x94] ss:$8 sps:$4 sm:$0xff]   ;;  %v695_v35 = vld [vmem:[#allocation2 + $0x90] ss:$8 sps:$4 sm:$0xff]  }
  0x19   :  { %331 = vmatprep.subr.bf16.mxu1 %v660_v12  ;;  %v696_v36 = vld [vmem:[#allocation2 + $0x84] ss:$8 sps:$4 sm:$0xff]   ;;  %v698_v37 = vld [vmem:[#allocation2 + $0x80] ss:$8 sps:$4 sm:$0xff]   ;;  %v699_v38 = vld [vmem:[%s864_s5 + $0x78] sm:$0xff]   ;;  %v54_v50 = vsub.s32 1, %v49_v49 }
  0x1a   :  { %v700_v39 = vld [vmem:[%s864_s5 + $0x38] sm:$0xff]   ;;  %v701_v40 = vld [vmem:[%s864_s5 + $0x70] sm:$0xff]   ;;  %622 = vmatprep.subr.bf16.mxu0 %v699_v38  ;;  %v703_v42 = vld [vmem:[%s864_s5 + $0x68] sm:$0xff]   ;;  %v50_v51 = vsub.s32 0, %v49_v49 }
  0x1b   :  { %623 = vmatpush3.bf16.msra.mxu0 %v700_v39  ;;  %v702_v41 = vld [vmem:[%s864_s5 + $0x30] sm:$0xff]   ;;  %v704_v43 = vld [vmem:[%s864_s5 + $0x28] sm:$0xff]   ;;  %v705_v44 = vld [vmem:[%s864_s5 + $0x60] sm:$0xff]  }
  0x1c   :  { %332 = vmatpush1.bf16.msra.mxu1 %v662_v13  ;;  %624 = vmatprep.subr.bf16.mxu0 %v701_v40  ;;  %v706_v45 = vld [vmem:[%s864_s5 + $0x20] sm:$0xff]   ;;  %v707_v46 = vld [vmem:[%s864_s5 + $0x58] sm:$0xff]   ;;  %v709_v5 = vld [vmem:[%s864_s5 + $0x50] sm:$0xff]  }
  0x1d   :  { %333 = vmatprep.subr.bf16.mxu1 %v663_v14  ;;  %v708_v47 = vld [vmem:[%s864_s5 + $0x18] sm:$0xff]   ;;  %v46_v52 = vld [vmem:[%s861_s2] sm:$0x3]  ;;  %v710_v6 = vld [vmem:[%s864_s5 + $0x10] sm:$0xff]  }
  0x1e   :  { %v55_v54 = vrot.slane %v46_v52, %v54_v50  ;;  %v51_v55 = vrot.slane %v46_v52, %v50_v51  ;;  %v711_v7 = vld [vmem:[%s864_s5 + $0x48] sm:$0xff]   ;;  %v713_v9 = vld [vmem:[%s864_s5 + $0x40] sm:$0xff]  }
  0x1f   :  { %625 = vmatpush3.bf16.msra.mxu0 %v702_v41  ;;  %v712_v8 = vld [vmem:[%s864_s5 + $0x8] sm:$0xff]   ;;  %v714_v10 = vld [vmem:[%s864_s5] sm:$0xff]  }
  0x20   :  { %334 = vmatpush1.bf16.msra.mxu1 %v665_v15  ;;  %626 = vmatprep.subr.bf16.mxu0 %v703_v42  ;;  %v153_v11 = vld [vmem:[%s863_s4] sm:$0x3] }
  0x21   :  { %335 = vmatprep.subr.bf16.mxu1 %v666_v16  ;;  %v162_v13 = vrot.slane %v153_v11, %v54_v50  ;;  %v158_v14 = vrot.slane %v153_v11, %v50_v51 }
  0x23   :  { %627 = vmatpush3.bf16.msra.mxu0 %v704_v43 }
  0x24   :  { %336 = vmatpush1.bf16.msra.mxu1 %v668_v17  ;;  %628 = vmatprep.subr.bf16.mxu0 %v705_v44 }
  0x25   :  { %337 = vmatprep.subr.bf16.mxu1 %v669_v18 }
  0x27   :  { %629 = vmatpush3.bf16.msra.mxu0 %v706_v45 }
  0x28   :  { %338 = vmatpush1.bf16.msra.mxu1 %v671_v19  ;;  %630 = vmatprep.subr.bf16.mxu0 %v707_v46 }
  0x29   :  { %339 = vmatprep.subr.bf16.mxu1 %v672_v20 }
  0x2b   :  { %631 = vmatpush3.bf16.msra.mxu0 %v708_v47 }
  0x2c   :  { %340 = vmatpush1.bf16.msra.mxu1 %v674_v21  ;;  %632 = vmatprep.subr.bf16.mxu0 %v709_v5 }
  0x2d   :  { %341 = vmatprep.subr.bf16.mxu1 %v675_v22 }
  0x2f   :  { %633 = vmatpush3.bf16.msra.mxu0 %v710_v6 }
  0x30   :  { %342 = vmatpush2.bf16.msra.mxu1 %v677_v23  ;;  %634 = vmatprep.subr.bf16.mxu0 %v711_v7 }
  0x31   :  { %343 = vmatprep.subr.bf16.mxu1 %v678_v24 }
  0x33   :  { %635 = vmatpush3.bf16.msra.mxu0 %v712_v8 }
  0x34   :  { %344 = vmatpush2.bf16.msra.mxu1 %v680_v25  ;;  %636 = vmatprep.subr.bf16.mxu0 %v713_v9 }
  0x35   :  { %345 = vmatprep.subr.bf16.mxu1 %v681_v26 }
  0x37   :  { %637 = vmatpush3.bf16.msra.mxu0 %v714_v10 }
  0x38   :  { %346 = vmatpush2.bf16.msra.mxu1 %v683_v27 }
  0x39   :  { %347 = vmatprep.subr.bf16.mxu1 %v684_v28 }
  0x3c   :  { %348 = vmatpush2.bf16.msra.mxu1 %v686_v29  ;;  %v601_v29 = vld [vmem:[%s865_s6] ss:$0 sm:$0xff] }
  0x3d   :  { %349 = vmatprep.subr.bf16.mxu1 %v687_v30 }
  0x40   :  { %350 = vmatpush2.bf16.msra.mxu1 %v689_v31 }
  0x41   :  { %351 = vmatprep.subr.bf16.mxu1 %v690_v32 }
  0x44   :  { %352 = vmatpush2.bf16.msra.mxu1 %v692_v33 }
  0x45   :  { %353 = vmatprep.subr.bf16.mxu1 %v693_v34 }
  0x48   :  { %354 = vmatpush2.bf16.msra.mxu1 %v695_v35 }
  0x49   :  { %355 = vmatprep.subr.bf16.mxu1 %v696_v36 }
  0x4c   :  { %356 = vmatpush2.bf16.msra.mxu1 %v698_v37 }
  0xd2   :  { %v106_v53 = vpop.f32.mrf.mxu0 }
  0xd3   :  { %v107_v60 = vadd.f32 %v106_v53, %v51_v55 }
  0xd4   :  { %v108_v56 = vpop.f32.mrf.mxu0 }
  0xd5   :  { %v109_v58 = vadd.f32 %v108_v56, %v55_v54  ;;  %v115_v2 = vmax.f32 %v107_v60, 0.0 }
  0xd6   :  { %v110_v57 = vpop.f32.mrf.mxu0 }
  0xd7   :  { %v111_v59 = vadd.f32 %v110_v57, %v51_v55  ;;  %v116_v0 = vmax.f32 %v109_v58, 0.0 }
  0xd8   :  { %v112_v61 = vpop.f32.mrf.mxu0 }
  0xd9   :  { %v113_v62 = vadd.f32 %v112_v61, %v55_v54  ;;  %v117_v63 = vmax.f32 %v111_v59, 0.0 }
  0xdb   :  { %v118_v1 = vmax.f32 %v113_v62, 0.0  ;;  %v119_v4 = vpack.c.bf16 %v117_v63, %v115_v2 }
  0xdd   :  { %v120_v3 = vpack.c.bf16 %v118_v1, %v116_v0 }
  0xdf   :  { %357 = vmatprep.mubr.bf16.mxu1 %v120_v3 }
  0xe0   :  { %358 = vmatmul.mubr.bf16.vlgmr.msra.gmra.mxu1 %v119_v4 }
 0x1a0   :  { %v359_v12 = vpop.f32.mrf.mxu1 }
 0x1a1   :  { %v360_v19 = vadd.f32 %v359_v12, %v158_v14 }
 0x1a2   :  { %v361_v15 = vpop.f32.mrf.mxu1 }
 0x1a3   :  { %v362_v17 = vadd.f32 %v361_v15, %v162_v13  ;;  %v368_v25 = vmax.f32 %v360_v19, 0.0 }
 0x1a4   :  { %v363_v16 = vpop.f32.mrf.mxu1 }
 0x1a5   :  { %v364_v18 = vadd.f32 %v363_v16, %v158_v14  ;;  %v369_v23 = vmax.f32 %v362_v17, 0.0 }
 0x1a6   :  { %v365_v20 = vpop.f32.mrf.mxu1 }
 0x1a7   :  { %v366_v21 = vadd.f32 %v365_v20, %v162_v13  ;;  %v370_v22 = vmax.f32 %v364_v18, 0.0 }
 0x1a9   :  { %v371_v24 = vmax.f32 %v366_v21, 0.0  ;;  %v372_v27 = vpack.c.bf16 %v370_v22, %v368_v25 }
 0x1ab   :  { %v373_v26 = vpack.c.bf16 %v371_v24, %v369_v23 }
 0x1ad   :  { %541 = vmatprep.mubr.bf16.mxu0 %v373_v26 }
 0x1ae   :  { %542 = vmatmul.mubr.bf16.vlgmr.msra.gmra.mxu0 %v372_v27 }
 0x26e   :  { %v638_v28 = vpop.f32.mrf.mxu0 }
 0x270   :  { %v639_v30 = vpop.f32.mrf.mxu0 }
 0x271   :  { %v640_v31 = vadd.f32 %v639_v30, %v638_v28 }
 0x272   :  { %v641_v32 = vpop.f32.mrf.mxu0 }
 0x273   :  { %v544_v33 = vadd.f32 %v640_v31, %v601_v29 }
 0x274   :  { %v642_v34 = vpop.f32.mrf.mxu0 }
 0x275   :  { %v620_v35 = vpack.c.bf16 %v544_v33, %v544_v33  ;;  %v643_v36 = vadd.f32 %v642_v34, %v641_v32 }
 0x277   :  { %559 = vst.msk [vmem:[%s866_s7] sm:$0xf] %vm558_vm1, %v620_v35  ;;  %v547_v37 = vadd.f32 %v643_v36, %v601_v29 }
 0x279   :  { %v621_v38 = vpack.c.bf16 %v547_v37, %v547_v37 }
 0x27b   :  { %560 = vst.msk [vmem:[%s866_s7 + $0x4] sm:$0xf] %vm558_vm1, %v621_v38 }
 0x27c   :  { %565 = vsyncpa [#allocation3], 1 }

</bundles_post_ra>
